<compile_context>
chip_gen: v7x
topology: tpu7x:2x2x1
jax: 0.10.0
libtpu: 0.0.40
codegen_flags: <defaults>
</compile_context>

<pallas_src>
import jax
import jax.numpy as jnp
from jax import lax
from jax.experimental import pallas as pl
from jax.experimental.pallas import tpu as pltpu


def rnn_kernel(x_ref, w_ih_ref, w_hh_ref, b_ref, w_fc_ref, b_fc_ref, out_ref, pre_ref):
    """Single-invocation kernel: hoisted projection + serial recurrence + fused FC.

    x_ref:    (T*B, I)  time-major flattened input, f32 (row block t*B:(t+1)*B is x_t)
    w_ih_ref: (I, H)    W_ih^T, bf16
    w_hh_ref: (H, H)    W_hh^T, bf16
    b_ref:    (1, H)    b_ih + b_hh, f32
    w_fc_ref: (H, O)    W_fc^T, bf16
    b_fc_ref: (1, O)    f32
    out_ref:  (B, O)    f32
    pre_ref:  (T*B, H)  f32 VMEM scratch for the hoisted input projection
    """
    B = out_ref.shape[0]
    T = x_ref.shape[0] // B
    H = w_hh_ref.shape[0]

    # --- hoisted input projection: ONE matmul for all timesteps ------------------
    # bf16 MXU operands (single MXU pass), f32 accumulation + bias.
    pre_ref[...] = (
        jnp.dot(x_ref[...].astype(jnp.bfloat16), w_ih_ref[...],
                preferred_element_type=jnp.float32)
        + b_ref[...]
    )

    w_hh = w_hh_ref[...]  # bf16, loaded once for all T steps

    # --- strictly serial H x H recurrence --------------------------------------
    def step(t, h):
        row = pl.multiple_of(t * B, B)           # aligned start: no copy in the loop
        pre_t = pre_ref[pl.ds(row, B), :]        # (B, H) f32
        hh = jnp.dot(h.astype(jnp.bfloat16), w_hh,
                     preferred_element_type=jnp.float32)
        return jnp.tanh(pre_t + hh)              # carry / bias / tanh stay f32

    h = lax.fori_loop(0, T, step, jnp.zeros((B, H), jnp.float32), unroll=True)

    # --- final FC on the last hidden state, fused once ---------------------------
    out_ref[...] = (
        jnp.dot(h.astype(jnp.bfloat16), w_fc_ref[...],
                preferred_element_type=jnp.float32)
        + b_fc_ref[...]
    ).astype(out_ref.dtype)


def prepare_params(w_ih, w_hh, b_ih, b_hh, w_fc, b_fc):
    """One-time parameter prep: pre-transpose, pre-cast weights to bf16, combine biases."""
    return (
        w_ih.T.astype(jnp.bfloat16),                       # (I, H)
        w_hh.T.astype(jnp.bfloat16),                       # (H, H)
        (b_ih + b_hh).reshape(1, -1).astype(jnp.float32),  # (1, H)
        w_fc.T.astype(jnp.bfloat16),                       # (H, O)
        b_fc.reshape(1, -1).astype(jnp.float32),           # (1, O)
    )


@jax.jit
def image_rnn_forward(x, params):
    """x: (batch, n_steps, n_inputs) f32 -- same layout as the torch module's input."""
    w_ih_t, w_hh_t, b_rnn, w_fc_t, b_out = params
    B, T, I = x.shape
    H = w_hh_t.shape[0]
    O = w_fc_t.shape[1]

    # Pad batch to a multiple of 8 (f32 sublane count) so per-step row slices are
    # tile-aligned inside the serial loop; padded rows are dropped on output.
    Bp = ((B + 7) // 8) * 8
    # X.permute(1, 0, 2) equivalent; this HBM transpose is the only per-call XLA op.
    x_tm = jnp.transpose(x, (1, 0, 2))                     # (T, B, I)
    if Bp != B:
        x_tm = jnp.pad(x_tm, ((0, 0), (0, Bp - B), (0, 0)))
    x_flat = x_tm.reshape(T * Bp, I).astype(jnp.float32)   # (T*Bp, I)

    vmem = pl.BlockSpec(memory_space=pltpu.MemorySpace.VMEM)  # whole array in VMEM
    out = pl.pallas_call(
        rnn_kernel,
        out_shape=jax.ShapeDtypeStruct((Bp, O), jnp.float32),
        in_specs=[vmem] * 6,
        out_specs=vmem,
        scratch_shapes=[pltpu.VMEM((T * Bp, H), jnp.float32)],
    )(x_flat, w_ih_t, w_hh_t, b_rnn, w_fc_t, b_out)

    return out[:B].reshape(-1, O)                          # out.view(-1, n_outputs)


def image_rnn_reference(x, w_ih, w_hh, b_ih, b_hh, w_fc, b_fc):
    """Pure-JAX f32 reference mirroring torch nn.RNN + nn.Linear."""
    x_seq = jnp.transpose(x, (1, 0, 2))
    B = x.shape[0]
    H = w_ih.shape[0]
    h = jnp.zeros((B, H), jnp.float32)
    for t in range(x_seq.shape[0]):
        h = jnp.tanh(x_seq[t] @ w_ih.T + b_ih + h @ w_hh.T + b_hh)
    return h @ w_fc.T + b_fc


if __name__ == "__main__":
    # module hyper-params (small, consistent with the forward pass)
    batch, n_steps, n_inputs, n_neurons, n_outputs = 8, 8, 16, 32, 8

    key = jax.random.PRNGKey(0)
    ks = jax.random.split(key, 7)
    # deterministic init, PyTorch-style uniform(-1/sqrt(H), 1/sqrt(H))
    s = 1.0 / jnp.sqrt(jnp.float32(n_neurons))
    w_ih = jax.random.uniform(ks[0], (n_neurons, n_inputs), jnp.float32, -s, s)
    w_hh = jax.random.uniform(ks[1], (n_neurons, n_neurons), jnp.float32, -s, s)
    b_ih = jax.random.uniform(ks[2], (n_neurons,), jnp.float32, -s, s)
    b_hh = jax.random.uniform(ks[3], (n_neurons,), jnp.float32, -s, s)
    w_fc = jax.random.uniform(ks[4], (n_outputs, n_neurons), jnp.float32, -s, s)
    b_fc = jax.random.uniform(ks[5], (n_outputs,), jnp.float32, -s, s)

    x = jax.random.normal(ks[6], (batch, n_steps, n_inputs), jnp.float32)

    params = prepare_params(w_ih, w_hh, b_ih, b_hh, w_fc, b_fc)
    out = image_rnn_forward(x, params)
    out = jax.block_until_ready(out)

    ref = image_rnn_reference(x, w_ih, w_hh, b_ih, b_hh, w_fc, b_fc)
    assert out.shape == (batch, n_outputs), out.shape
    # bf16 MXU operands (f32 accumulation / tanh) -> relaxed parity vs the f32 reference.
    max_err = float(jnp.abs(out - ref).max())
    assert jnp.allclose(out, ref, atol=3e-2, rtol=3e-2), max_err

    print("KERNEL_OK")
</pallas_src>

<mosaic_0001>
module attributes {stable_mosaic.version = 11 : i64} {
  func.func @rnn_kernel(%arg0: memref<64x16xf32, #tpu.memory_space<vmem>>, %arg1: memref<16x32xbf16, #tpu.memory_space<vmem>>, %arg2: memref<32x32xbf16, #tpu.memory_space<vmem>>, %arg3: memref<1x32xf32, #tpu.memory_space<vmem>>, %arg4: memref<32x8xbf16, #tpu.memory_space<vmem>>, %arg5: memref<1x8xf32, #tpu.memory_space<vmem>>, %arg6: memref<8x8xf32, #tpu.memory_space<vmem>>, %arg7: memref<64x32xf32, #tpu.memory_space<vmem>>) attributes {dimension_semantics = [], scalar_prefetch = 0 : i64, scratch_operands = 1 : i64, tpu.core_type = #tpu.core_type<tc>} {
    %c0 = arith.constant 0 : index
    %c0_0 = arith.constant 0 : index
    %0 = vector.load %arg0[%c0, %c0_0] : memref<64x16xf32, #tpu.memory_space<vmem>>, vector<64x16xf32>
    %1 = arith.truncf %0 : vector<64x16xf32> to vector<64x16xbf16>
    %c0_1 = arith.constant 0 : index
    %c0_2 = arith.constant 0 : index
    %2 = vector.load %arg1[%c0_1, %c0_2] : memref<16x32xbf16, #tpu.memory_space<vmem>>, vector<16x32xbf16>
    %cst = arith.constant dense<0.000000e+00> : vector<64x32xf32>
    %3 = tpu.matmul %1, %2, %cst {dimension_numbers = #tpu.dot_dimension_numbers<[1], [0], [0], [1], [0, 0, 1, 1], [], []>} : vector<64x16xbf16>, vector<16x32xbf16>, vector<64x32xf32> -> vector<64x32xf32>
    %c0_3 = arith.constant 0 : index
    %c0_4 = arith.constant 0 : index
    %4 = vector.load %arg3[%c0_3, %c0_4] : memref<1x32xf32, #tpu.memory_space<vmem>>, vector<1x32xf32>
    %5 = vector.broadcast %4 : vector<1x32xf32> to vector<64x32xf32>
    %6 = arith.addf %3, %5 : vector<64x32xf32>
    %c0_5 = arith.constant 0 : index
    %c0_6 = arith.constant 0 : index
    %7 = vector.load %arg7[%c0_5, %c0_6] : memref<64x32xf32, #tpu.memory_space<vmem>>, vector<64x32xf32>
    tpu.vector_store %arg7[%c0_5, %c0_6], %6 {strides = array<i32>} : memref<64x32xf32, #tpu.memory_space<vmem>>, vector<64x32xf32>,
    %c0_7 = arith.constant 0 : index
    %c0_8 = arith.constant 0 : index
    %8 = vector.load %arg2[%c0_7, %c0_8] : memref<32x32xbf16, #tpu.memory_space<vmem>>, vector<32x32xbf16>
    %cst_9 = arith.constant 0.000000e+00 : f32
    %9 = vector.broadcast %cst_9 : f32 to vector<8x32xf32>
    %c0_i32 = arith.constant 0 : i32
    %c8_i32 = arith.constant 8 : i32
    %10 = arith.muli %c0_i32, %c8_i32 : i32
    %11 = tpu.assume_multiple %10, 8 : i32
    %12 = arith.index_cast %11 : i32 to index
    %c0_10 = arith.constant 0 : index
    %13 = vector.load %arg7[%12, %c0_10] : memref<64x32xf32, #tpu.memory_space<vmem>>, vector<8x32xf32>
    %14 = arith.truncf %9 : vector<8x32xf32> to vector<8x32xbf16>
    %cst_11 = arith.constant dense<0.000000e+00> : vector<8x32xf32>
    %15 = tpu.matmul %14, %8, %cst_11 {dimension_numbers = #tpu.dot_dimension_numbers<[1], [0], [0], [1], [0, 0, 1, 1], [], []>} : vector<8x32xbf16>, vector<32x32xbf16>, vector<8x32xf32> -> vector<8x32xf32>
    %16 = arith.addf %13, %15 : vector<8x32xf32>
    %17 = math.tanh %16 : vector<8x32xf32>
    %c1_i32 = arith.constant 1 : i32
    %c8_i32_12 = arith.constant 8 : i32
    %18 = arith.muli %c1_i32, %c8_i32_12 : i32
    %19 = tpu.assume_multiple %18, 8 : i32
    %20 = arith.index_cast %19 : i32 to index
    %c0_13 = arith.constant 0 : index
    %21 = vector.load %arg7[%20, %c0_13] : memref<64x32xf32, #tpu.memory_space<vmem>>, vector<8x32xf32>
    %22 = arith.truncf %17 : vector<8x32xf32> to vector<8x32xbf16>
    %cst_14 = arith.constant dense<0.000000e+00> : vector<8x32xf32>
    %23 = tpu.matmul %22, %8, %cst_14 {dimension_numbers = #tpu.dot_dimension_numbers<[1], [0], [0], [1], [0, 0, 1, 1], [], []>} : vector<8x32xbf16>, vector<32x32xbf16>, vector<8x32xf32> -> vector<8x32xf32>
    %24 = arith.addf %21, %23 : vector<8x32xf32>
    %25 = math.tanh %24 : vector<8x32xf32>
    %c2_i32 = arith.constant 2 : i32
    %c8_i32_15 = arith.constant 8 : i32
    %26 = arith.muli %c2_i32, %c8_i32_15 : i32
    %27 = tpu.assume_multiple %26, 8 : i32
    %28 = arith.index_cast %27 : i32 to index
    %c0_16 = arith.constant 0 : index
    %29 = vector.load %arg7[%28, %c0_16] : memref<64x32xf32, #tpu.memory_space<vmem>>, vector<8x32xf32>
    %30 = arith.truncf %25 : vector<8x32xf32> to vector<8x32xbf16>
    %cst_17 = arith.constant dense<0.000000e+00> : vector<8x32xf32>
    %31 = tpu.matmul %30, %8, %cst_17 {dimension_numbers = #tpu.dot_dimension_numbers<[1], [0], [0], [1], [0, 0, 1, 1], [], []>} : vector<8x32xbf16>, vector<32x32xbf16>, vector<8x32xf32> -> vector<8x32xf32>
    %32 = arith.addf %29, %31 : vector<8x32xf32>
    %33 = math.tanh %32 : vector<8x32xf32>
    %c3_i32 = arith.constant 3 : i32
    %c8_i32_18 = arith.constant 8 : i32
    %34 = arith.muli %c3_i32, %c8_i32_18 : i32
    %35 = tpu.assume_multiple %34, 8 : i32
    %36 = arith.index_cast %35 : i32 to index
    %c0_19 = arith.constant 0 : index
    %37 = vector.load %arg7[%36, %c0_19] : memref<64x32xf32, #tpu.memory_space<vmem>>, vector<8x32xf32>
    %38 = arith.truncf %33 : vector<8x32xf32> to vector<8x32xbf16>
    %cst_20 = arith.constant dense<0.000000e+00> : vector<8x32xf32>
    %39 = tpu.matmul %38, %8, %cst_20 {dimension_numbers = #tpu.dot_dimension_numbers<[1], [0], [0], [1], [0, 0, 1, 1], [], []>} : vector<8x32xbf16>, vector<32x32xbf16>, vector<8x32xf32> -> vector<8x32xf32>
    %40 = arith.addf %37, %39 : vector<8x32xf32>
    %41 = math.tanh %40 : vector<8x32xf32>
    %c4_i32 = arith.constant 4 : i32
    %c8_i32_21 = arith.constant 8 : i32
    %42 = arith.muli %c4_i32, %c8_i32_21 : i32
    %43 = tpu.assume_multiple %42, 8 : i32
    %44 = arith.index_cast %43 : i32 to index
    %c0_22 = arith.constant 0 : index
    %45 = vector.load %arg7[%44, %c0_22] : memref<64x32xf32, #tpu.memory_space<vmem>>, vector<8x32xf32>
    %46 = arith.truncf %41 : vector<8x32xf32> to vector<8x32xbf16>
    %cst_23 = arith.constant dense<0.000000e+00> : vector<8x32xf32>
    %47 = tpu.matmul %46, %8, %cst_23 {dimension_numbers = #tpu.dot_dimension_numbers<[1], [0], [0], [1], [0, 0, 1, 1], [], []>} : vector<8x32xbf16>, vector<32x32xbf16>, vector<8x32xf32> -> vector<8x32xf32>
    %48 = arith.addf %45, %47 : vector<8x32xf32>
    %49 = math.tanh %48 : vector<8x32xf32>
    %c5_i32 = arith.constant 5 : i32
    %c8_i32_24 = arith.constant 8 : i32
    %50 = arith.muli %c5_i32, %c8_i32_24 : i32
    %51 = tpu.assume_multiple %50, 8 : i32
    %52 = arith.index_cast %51 : i32 to index
    %c0_25 = arith.constant 0 : index
    %53 = vector.load %arg7[%52, %c0_25] : memref<64x32xf32, #tpu.memory_space<vmem>>, vector<8x32xf32>
    %54 = arith.truncf %49 : vector<8x32xf32> to vector<8x32xbf16>
    %cst_26 = arith.constant dense<0.000000e+00> : vector<8x32xf32>
    %55 = tpu.matmul %54, %8, %cst_26 {dimension_numbers = #tpu.dot_dimension_numbers<[1], [0], [0], [1], [0, 0, 1, 1], [], []>} : vector<8x32xbf16>, vector<32x32xbf16>, vector<8x32xf32> -> vector<8x32xf32>
    %56 = arith.addf %53, %55 : vector<8x32xf32>
    %57 = math.tanh %56 : vector<8x32xf32>
    %c6_i32 = arith.constant 6 : i32
    %c8_i32_27 = arith.constant 8 : i32
    %58 = arith.muli %c6_i32, %c8_i32_27 : i32
    %59 = tpu.assume_multiple %58, 8 : i32
    %60 = arith.index_cast %59 : i32 to index
    %c0_28 = arith.constant 0 : index
    %61 = vector.load %arg7[%60, %c0_28] : memref<64x32xf32, #tpu.memory_space<vmem>>, vector<8x32xf32>
    %62 = arith.truncf %57 : vector<8x32xf32> to vector<8x32xbf16>
    %cst_29 = arith.constant dense<0.000000e+00> : vector<8x32xf32>
    %63 = tpu.matmul %62, %8, %cst_29 {dimension_numbers = #tpu.dot_dimension_numbers<[1], [0], [0], [1], [0, 0, 1, 1], [], []>} : vector<8x32xbf16>, vector<32x32xbf16>, vector<8x32xf32> -> vector<8x32xf32>
    %64 = arith.addf %61, %63 : vector<8x32xf32>
    %65 = math.tanh %64 : vector<8x32xf32>
    %c7_i32 = arith.constant 7 : i32
    %c8_i32_30 = arith.constant 8 : i32
    %66 = arith.muli %c7_i32, %c8_i32_30 : i32
    %67 = tpu.assume_multiple %66, 8 : i32
    %68 = arith.index_cast %67 : i32 to index
    %c0_31 = arith.constant 0 : index
    %69 = vector.load %arg7[%68, %c0_31] : memref<64x32xf32, #tpu.memory_space<vmem>>, vector<8x32xf32>
    %70 = arith.truncf %65 : vector<8x32xf32> to vector<8x32xbf16>
    %cst_32 = arith.constant dense<0.000000e+00> : vector<8x32xf32>
    %71 = tpu.matmul %70, %8, %cst_32 {dimension_numbers = #tpu.dot_dimension_numbers<[1], [0], [0], [1], [0, 0, 1, 1], [], []>} : vector<8x32xbf16>, vector<32x32xbf16>, vector<8x32xf32> -> vector<8x32xf32>
    %72 = arith.addf %69, %71 : vector<8x32xf32>
    %73 = math.tanh %72 : vector<8x32xf32>
    %c8_i32_33 = arith.constant 8 : i32
    %74 = arith.truncf %73 : vector<8x32xf32> to vector<8x32xbf16>
    %c0_34 = arith.constant 0 : index
    %c0_35 = arith.constant 0 : index
    %75 = vector.load %arg4[%c0_34, %c0_35] : memref<32x8xbf16, #tpu.memory_space<vmem>>, vector<32x8xbf16>
    %cst_36 = arith.constant dense<0.000000e+00> : vector<8x8xf32>
    %76 = tpu.matmul %74, %75, %cst_36 {dimension_numbers = #tpu.dot_dimension_numbers<[1], [0], [0], [1], [0, 0, 1, 1], [], []>} : vector<8x32xbf16>, vector<32x8xbf16>, vector<8x8xf32> -> vector<8x8xf32>
    %c0_37 = arith.constant 0 : index
    %c0_38 = arith.constant 0 : index
    %77 = vector.load %arg5[%c0_37, %c0_38] : memref<1x8xf32, #tpu.memory_space<vmem>>, vector<1x8xf32>
    %78 = vector.broadcast %77 : vector<1x8xf32> to vector<8x8xf32>
    %79 = arith.addf %76, %78 : vector<8x8xf32>
    %c0_39 = arith.constant 0 : index
    %c0_40 = arith.constant 0 : index
    %80 = vector.load %arg6[%c0_39, %c0_40] : memref<8x8xf32, #tpu.memory_space<vmem>>, vector<8x8xf32>
    tpu.vector_store %arg6[%c0_39, %c0_40], %79 {strides = array<i32>} : memref<8x8xf32, #tpu.memory_space<vmem>>, vector<8x8xf32>,
    return
  }
}

</mosaic_0001>

<bundles_post_ra>
// kernel: image_rnn_forward.1
= control target key start
LH: loop header
LB: loop body
LE: loop exit
PB: predicated region body
PF: predicated region fallthrough
CT: control target
= control target key end

     0   :  { %vm52_vm0 = vcmask 130048   ;;  %v802_v6 = vmov 0.0   ;;  %vm803_vm1 = vmmov 0   ;;  %s974_s0 = inlined_call_operand.vmem [shape: f32[64,16], index: 0, kind: input, shape index: {}]   ;;  %s975_s1 = inlined_call_operand.vmem [shape: bf16[16,32], index: 1, kind: input, shape index: {}]   ;;  %s976_s2 = inlined_call_operand.vmem [shape: bf16[32,32], index: 2, kind: input, shape index: {}]   ;;  %s977_s3 = inlined_call_operand.vmem [shape: f32[1,32], index: 3, kind: input, shape index: {}]   ;;  %s978_s4 = inlined_call_operand.vmem [shape: bf16[32,8], index: 4, kind: input, shape index: {}]   ;;  %s979_s5 = inlined_call_operand.vmem [shape: f32[1,8], index: 5, kind: input, shape index: {}]   ;;  %s980_s6 = inlined_call_operand.hbm [shape: f32[8,8], index: 6, kind: output, shape index: {}]  }
   0x1   :  { %v757_v0 = vld [vmem:[%s975_s1] sm:$0xff]   ;;  %v26_v2 = vld [vmem:[%s974_s0 + $0x8] sm:$0xff]  ;;  %v27_v3 = vld [vmem:[%s974_s0 + $0x10] sm:$0xff]  ;;  %681 = vmatprep.subr.bf16.mxu1 %v802_v6  ;;  %685 = vmatprep.mubr.msk.bf16.mxu1 %vm803_vm1, %v802_v6 }
   0x2   :  { %v25_v1 = vld [vmem:[%s974_s0] sm:$0xff]  ;;  %671 = vmatprep.subr.bf16.mxu0 %v757_v0  ;;  %v28_v5 = vld [vmem:[%s974_s0 + $0x18] sm:$0xff]  ;;  %v868_v9 = vld [vmem:[%s976_s2 + $0x8] sm:$0xff]  }
   0x3   :  { %v33_v4 = vpack.c.bf16 %v26_v2, %v25_v1  ;;  %672 = vmatpush3.bf16.msra.mxu0 %v757_v0  ;;  %v34_v7 = vpack.c.bf16 %v28_v5, %v27_v3  ;;  %v860_v8 = vld [vmem:[%s976_s2] sm:$0xff]  }
   0x4   :  { %697 = vmatprep.subr.bf16.mxu0 %v802_v6  ;;  %682 = vmatpush3.bf16.msra.mxu1 %v860_v8 }
   0x5   :  { %673 = vmatprep.mubr.msk.bf16.mxu0 %vm52_vm0, %v33_v4 }
   0x6   :  { %11 = vsyncpa [#allocation4], 0  ;;  %674 = vmatmul.mubr.msk.bf16.vlgmr.msra.gmra.mrb[0].mxu0 %vm52_vm0, %v34_v7  ;;  %683 = vmatprep.subr.bf16.mxu1 %v802_v6  ;;  %v804_v10 = vmov 0   ;;  %v620_v11 = vld [vmem:[%s977_s3] ss:$0 sm:$0xff]  ;;  %vm130_vm2 = vcmask 261120  }
   0x7   :  { %698 = vmatpush3.bf16.msra.mxu0 %v860_v8  ;;  %v29_v28 = vld [vmem:[%s974_s0 + $0x20] sm:$0xff]  ;;  %v30_v29 = vld [vmem:[%s974_s0 + $0x28] sm:$0xff]  ;;  %v31_v31 = vld [vmem:[%s974_s0 + $0x30] sm:$0xff]  ;;  %s805_s23 = smov [#allocation3]   ;;  %vm604_vm3 = vcmask 64512  }
   0x8   :  { %699 = vmatprep.subr.bf16.mxu0 %v802_v6  ;;  %684 = vmatpush3.bf16.msra.mxu1 %v868_v9  ;;  %v35_v30 = vpack.c.bf16 %v30_v29, %v29_v28  ;;  %v32_v32 = vld [vmem:[%s974_s0 + $0x38] sm:$0xff]  ;;  %v761_v28 = vld [vmem:[%s978_s4 + $0x8] sm:$0xff]   ;;  %s612_s24 = sshll.u32 %s805_s23, 4  ;;  %s613_s24 = int_to_ptr.vmem [resolvable:$true] %s612_s24 }
   0x9   :  { %689 = vmatprep.subr.bf16.mxu1 %v802_v6  ;;  %v36_v33 = vpack.c.bf16 %v32_v32, %v31_v31  ;;  %p783_p1 = scmp.lt.s32.totalorder %s613_s24, %s613_s24 }
   0xa   :  { %677 = vmatprep.mubr.msk.bf16.mxu0 %vm52_vm0, %v35_v30 }
   0xb   :  { %700 = vmatpush3.bf16.msra.mxu0 %v868_v9  ;;  %686 = vmatmul.mubr.bf16.vlgmr.msra.gmra.mrb[0].mxu1 %v804_v10 }
   0xc   :  { %713 = vmatprep.subr.bf16.mxu0 %v802_v6  ;;  %690 = vmatpush3.bf16.msra.mxu1 %v860_v8 }
   0xd   :  { %693 = vmatprep.mubr.msk.bf16.mxu1 %vm803_vm1, %v802_v6  ;;  %691 = vmatprep.subr.bf16.mxu1 %v802_v6 }
   0xe   :  { %678 = vmatmul.mubr.msk.bf16.gmra.mrb[4].mxu0 %vm52_vm0, %v36_v33 }
   0xf   :  { %701 = vmatprep.mubr.msk.bf16.mxu0 %vm803_vm1, %v802_v6 }
  0x10   :  { %692 = vmatpush3.bf16.msra.mxu1 %v868_v9 }
  0x11   :  { %705 = vmatprep.subr.bf16.mxu1 %v802_v6 }
  0xd9   :  { %v675_v12 = vpop.f32.mrb[0].mxu0 }
  0xda   :  { %v108_v13 = vadd.f32 %v675_v12, %v620_v11  ;;  %v99_v14 = vpop.f32.mrb[1].mxu0 }
  0xdb   :  { %v100_v15 = vadd.f32 %v620_v11, %v99_v14  ;;  %v676_v16 = vpop.f32.mrb[2].mxu0 }
  0xdc   :  { %133 = vst.msk [vmem:[#allocation2 + $0x10] sm:$0xff] %vm130_vm2, %v108_v13  ;;  %v111_v17 = vadd.f32 %v676_v16, %v620_v11  ;;  %v102_v18 = vpop.f32.mrb[3].mxu0 }
  0xdd   :  { %131 = vst.msk [vmem:[#allocation2] sm:$0xff] %vm130_vm2, %v100_v15  ;;  %v103_v19 = vadd.f32 %v620_v11, %v102_v18 }
  0xde   :  { %134 = vst.msk [vmem:[#allocation2 + $0x18] sm:$0xff] %vm130_vm2, %v111_v17  ;;  %v193_v20 = vpop.f32.mrb[0].mxu1 }
  0xdf   :  { %132 = vst.msk [vmem:[#allocation2 + $0x8] sm:$0xff] %vm130_vm2, %v103_v19  ;;  %v687_v21 = vpop.f32.mrb[1].mxu1 }
  0xe0   :  { %v196_v22 = vpop.f32.mrb[2].mxu1 }
  0xe1   :  { %v688_v23 = vpop.f32.mrb[3].mxu1  ;;  %v679_v42 = vpop.f32.mrb[4].mxu0 }
  0xe2   :  { %v124_v43 = vadd.f32 %v679_v42, %v620_v11  ;;  %v115_v44 = vpop.f32.mrb[5].mxu0 }
  0xe3   :  { %v116_v45 = vadd.f32 %v620_v11, %v115_v44  ;;  %v680_v46 = vpop.f32.mrb[6].mxu0  ;;  %v250_v50 = vld [vmem:[#allocation2 + $0x10] sm:$0xff] }
  0xe4   :  { %v143_v24 = vld [vmem:[#allocation2] sm:$0xff]  ;;  %137 = vst.msk [vmem:[#allocation2 + $0x30] sm:$0xff] %vm130_vm2, %v124_v43  ;;  %v127_v47 = vadd.f32 %v680_v46, %v620_v11  ;;  %v118_v48 = vpop.f32.mrb[7].mxu0 }
  0xe5   :  { %v199_v25 = vadd.f32 %v193_v20, %v143_v24  ;;  %135 = vst.msk [vmem:[#allocation2 + $0x20] sm:$0xff] %vm130_vm2, %v116_v45  ;;  %v119_v49 = vadd.f32 %v620_v11, %v118_v48  ;;  %v298_v58 = vld [vmem:[#allocation2 + $0x18] sm:$0xff] }
  0xe6   :  { %v202_v34 = vld [vmem:[#allocation2 + $0x8] sm:$0xff]  ;;  %138 = vst.msk [vmem:[#allocation2 + $0x38] sm:$0xff] %vm130_vm2, %v127_v47 }
  0xe7   :  { %762 = vtanh.f32 %v199_v25  ;;  %136 = vst.msk [vmem:[#allocation2 + $0x28] sm:$0xff] %vm130_vm2, %v119_v49 }
  0xec   :  { %v346_v2 = vld [vmem:[#allocation2 + $0x20] sm:$0xff] }
  0xed   :  { %v490_v29 = vld [vmem:[#allocation2 + $0x38] sm:$0xff] }
  0xee   :  { %v394_v13 = vld [vmem:[#allocation2 + $0x28] sm:$0xff] }
  0xf1   :  { %v763_v26 = vpop.eup %762 }
  0xf2   :  { %v203_v27 = vpack.c.bf16 %v763_v26, %v763_v26 }
  0xf4   :  { %694 = vmatmul.mubr.msk.bf16.vlgmr.msra.gmra.mrb[4].mxu1 %vm130_vm2, %v203_v27  ;;  %v760_v27 = vld [vmem:[%s978_s4] sm:$0xff]   ;;  %s778_s4 = scalar_lea.vmem %s613_s24, 128 }
  0xf5   :  { %706 = vmatpush3.bf16.msra.mxu1 %v860_v8  ;;  %709 = vmatprep.mubr.msk.bf16.mxu1 %vm803_vm1, %v802_v6  ;;  %p779_p0 = scmp.ne.s32.totalorder %s613_s24, %s778_s4  ;;  %p784_p2 = scmp.lt.s32.totalorder %s778_s4, %s778_s4 }
  0xf6   :  { %707 = vmatprep.subr.bf16.mxu1 %v802_v6 }
  0xf7   :  { %p785_p3 = por %p784_p2, %p783_p1 }
  0xf9   :  { %708 = vmatpush3.bf16.msra.mxu1 %v868_v9  ;;  %p786_p4 = pnand %p785_p3, %p779_p0 }
  0xfa   :  { %721 = vmatprep.subr.bf16.mxu1 %v802_v6 }
 0x1c7   :  { %v241_v35 = vpop.f32.mrb[4].mxu1 }
 0x1c8   :  { %v247_v36 = vadd.f32 %v241_v35, %v202_v34  ;;  %v695_v37 = vpop.f32.mrb[5].mxu1 }
 0x1c9   :  { %v244_v38 = vpop.f32.mrb[6].mxu1 }
 0x1ca   :  { %764 = vtanh.f32 %v247_v36  ;;  %v696_v39 = vpop.f32.mrb[7].mxu1 }
 0x1d4   :  { %v765_v40 = vpop.eup %764 }
 0x1d5   :  { %v251_v41 = vpack.c.bf16 %v765_v40, %v765_v40 }
 0x1d7   :  { %702 = vmatmul.mubr.msk.bf16.vlgmr.msra.gmra.mrb[8].mxu0 %vm130_vm2, %v251_v41 }
 0x1d8   :  { %714 = vmatpush3.bf16.msra.mxu0 %v860_v8  ;;  %717 = vmatprep.mubr.msk.bf16.mxu0 %vm803_vm1, %v802_v6 }
 0x1d9   :  { %715 = vmatprep.subr.bf16.mxu0 %v802_v6 }
 0x1dc   :  { %716 = vmatpush3.bf16.msra.mxu0 %v868_v9 }
 0x1dd   :  { %729 = vmatprep.subr.bf16.mxu0 %v802_v6 }
 0x2aa   :  { %v289_v51 = vpop.f32.mrb[8].mxu0 }
 0x2ab   :  { %v295_v52 = vadd.f32 %v289_v51, %v250_v50  ;;  %v703_v53 = vpop.f32.mrb[9].mxu0 }
 0x2ac   :  { %v292_v54 = vpop.f32.mrb[10].mxu0 }
 0x2ad   :  { %766 = vtanh.f32 %v295_v52  ;;  %v704_v55 = vpop.f32.mrb[11].mxu0 }
 0x2b7   :  { %v767_v56 = vpop.eup %766 }
 0x2b8   :  { %v299_v57 = vpack.c.bf16 %v767_v56, %v767_v56 }
 0x2ba   :  { %710 = vmatmul.mubr.msk.bf16.vlgmr.msra.gmra.mrb[8].mxu1 %vm130_vm2, %v299_v57 }
 0x2bb   :  { %722 = vmatpush3.bf16.msra.mxu1 %v860_v8  ;;  %725 = vmatprep.mubr.msk.bf16.mxu1 %vm803_vm1, %v802_v6 }
 0x2bc   :  { %723 = vmatprep.subr.bf16.mxu1 %v802_v6 }
 0x2bf   :  { %724 = vmatpush3.bf16.msra.mxu1 %v868_v9 }
 0x2c0   :  { %737 = vmatprep.subr.bf16.mxu1 %v802_v6 }
 0x38d   :  { %v337_v59 = vpop.f32.mrb[8].mxu1 }
 0x38e   :  { %v343_v60 = vadd.f32 %v337_v59, %v298_v58  ;;  %v711_v61 = vpop.f32.mrb[9].mxu1 }
 0x38f   :  { %v340_v62 = vpop.f32.mrb[10].mxu1 }
 0x390   :  { %768 = vtanh.f32 %v343_v60  ;;  %v712_v63 = vpop.f32.mrb[11].mxu1 }
 0x39a   :  { %v769_v0 = vpop.eup %768 }
 0x39b   :  { %v347_v1 = vpack.c.bf16 %v769_v0, %v769_v0 }
 0x39d   :  { %718 = vmatmul.mubr.msk.bf16.vlgmr.msra.gmra.mrb[12].mxu0 %vm130_vm2, %v347_v1 }
 0x39e   :  { %730 = vmatpush3.bf16.msra.mxu0 %v860_v8  ;;  %733 = vmatprep.mubr.msk.bf16.mxu0 %vm803_vm1, %v802_v6 }
 0x39f   :  { %731 = vmatprep.subr.bf16.mxu0 %v802_v6 }
 0x3a2   :  { %732 = vmatpush3.bf16.msra.mxu0 %v868_v9 }
 0x3a3   :  { %745 = vmatprep.subr.bf16.mxu0 %v802_v6 }
 0x470   :  { %v385_v3 = vpop.f32.mrb[12].mxu0 }
 0x471   :  { %v391_v4 = vadd.f32 %v385_v3, %v346_v2  ;;  %v719_v5 = vpop.f32.mrb[13].mxu0 }
 0x472   :  { %v388_v7 = vpop.f32.mrb[14].mxu0 }
 0x473   :  { %770 = vtanh.f32 %v391_v4  ;;  %v720_v10 = vpop.f32.mrb[15].mxu0 }
 0x47d   :  { %v771_v11 = vpop.eup %770 }
 0x47e   :  { %v395_v12 = vpack.c.bf16 %v771_v11, %v771_v11 }
 0x480   :  { %726 = vmatmul.mubr.msk.bf16.vlgmr.msra.gmra.mrb[12].mxu1 %vm130_vm2, %v395_v12 }
 0x481   :  { %738 = vmatpush3.bf16.msra.mxu1 %v860_v8  ;;  %741 = vmatprep.mubr.msk.bf16.mxu1 %vm803_vm1, %v802_v6  ;;  %v442_v8 = vld [vmem:[#allocation2 + $0x30] sm:$0xff] }
 0x482   :  { %739 = vmatprep.subr.bf16.mxu1 %v802_v6 }
 0x485   :  { %740 = vmatpush3.bf16.msra.mxu1 %v868_v9 }
 0x553   :  { %v433_v14 = vpop.f32.mrb[12].mxu1 }
 0x554   :  { %v439_v15 = vadd.f32 %v433_v14, %v394_v13  ;;  %v727_v16 = vpop.f32.mrb[13].mxu1 }
 0x555   :  { %v436_v17 = vpop.f32.mrb[14].mxu1 }
 0x556   :  { %772 = vtanh.f32 %v439_v15  ;;  %v728_v18 = vpop.f32.mrb[15].mxu1 }
 0x560   :  { %v773_v19 = vpop.eup %772 }
 0x561   :  { %v443_v20 = vpack.c.bf16 %v773_v19, %v773_v19 }
 0x563   :  { %734 = vmatmul.mubr.msk.bf16.vlgmr.msra.gmra.mrb[16].mxu0 %vm130_vm2, %v443_v20 }
 0x564   :  { %749 = vmatprep.mubr.msk.bf16.mxu0 %vm803_vm1, %v802_v6  ;;  %746 = vmatpush3.bf16.msra.mxu0 %v760_v27 }
 0x565   :  { %747 = vmatprep.subr.bf16.mxu0 %v802_v6  ;;  %v635_v6 = vld [vmem:[%s979_s5] ss:$0 sm:$0xff] }
 0x568   :  { %748 = vmatpush3.bf16.msra.mxu0 %v761_v28 }
 0x636   :  { %v481_v21 = vpop.f32.mrb[16].mxu0 }
 0x637   :  { %v487_v22 = vadd.f32 %v481_v21, %v442_v8  ;;  %v735_v23 = vpop.f32.mrb[17].mxu0 }
 0x638   :  { %v484_v24 = vpop.f32.mrb[18].mxu0 }
 0x639   :  { %774 = vtanh.f32 %v487_v22  ;;  %v736_v9 = vpop.f32.mrb[19].mxu0 }
 0x643   :  { %v775_v25 = vpop.eup %774 }
 0x644   :  { %v491_v26 = vpack.c.bf16 %v775_v25, %v775_v25 }
 0x646   :  { %742 = vmatmul.mubr.msk.bf16.vlgmr.msra.gmra.mrb[16].mxu1 %vm130_vm2, %v491_v26 }
 0x719   :  { %v529_v30 = vpop.f32.mrb[16].mxu1 }
 0x71a   :  { %v535_v31 = vadd.f32 %v529_v30, %v490_v29  ;;  %v743_v32 = vpop.f32.mrb[17].mxu1 }
 0x71b   :  { %v532_v33 = vpop.f32.mrb[18].mxu1 }
 0x71c   :  { %776 = vtanh.f32 %v535_v31  ;;  %v744_v34 = vpop.f32.mrb[19].mxu1 }
 0x726   :  { %v777_v35 = vpop.eup %776 }
 0x727   :  { %v537_v36 = vpack.c.bf16 %v777_v35, %v777_v35 }
 0x729   :  { %750 = vmatmul.mubr.msk.bf16.vlgmr.msra.gmra.mrb[20].mxu0 %vm130_vm2, %v537_v36 }
 0x7fc   :  { %v598_v37 = vpop.f32.mrb[20].mxu0 }
 0x7fd   :  { %v599_v38 = vadd.f32 %v635_v6, %v598_v37  ;;  %v751_v39 = vpop.f32.mrb[21].mxu0 }
 0x7fe   :  { %v601_v40 = vpop.f32.mrb[22].mxu0 }
 0x7ff   :  { %v752_v41 = vpop.f32.mrb[23].mxu0  ;;  %605 = vst.msk [vmem:[#allocation3] sm:$0xff] %vm604_vm3, %v599_v38 }
 0x800   :  { %789 = shalt.err (!%p786_p4)
}
 0x801   :  { %s790_s5 = scalar_lea.hbm %s980_s6, 128 }
 0x802   :  { %p791_p5 = scmp.ne.s32.totalorder %s980_s6, %s790_s5  ;;  %p794_p6 = scmp.lt.u32.totalorder %s790_s5, %s980_s6 }
 0x804   :  { %p796_p7 = pnand %p794_p6, %p791_p5 }
 0x806   :  { %799 = shalt.err (!%p796_p7)
}
 0x807   :  { %615 = dma.vmem_to_hbm [thread:$0]  %s613_s24, 128, %s980_s6, [#allocation4]  }
 0x808   :  { %800 = dma.done.wait [#allocation4], 128  }
 0x809   :  { %801 = vsyncadd [#allocation4], 4294967168 }
 0x80a   :  { %619 = vsyncpa [#allocation4], 1 }

</bundles_post_ra>
